<compile_context>
chip_gen: v7x
topology: tpu7x:2x2x1
jax: 0.10.0
libtpu: 0.0.40
codegen_flags: <defaults>
</compile_context>

<pallas_src>
import functools

import jax
import jax.numpy as jnp
from jax.experimental import pallas as pl
from jax.experimental.pallas import tpu as pltpu


def _tpu_vmem_capacity_bytes():
    try:
        return int(pltpu.get_tpu_info().vmem_capacity_bytes)
    except Exception:
        return 64 * 1024 * 1024  # conservative (v7x-sized) fallback


def _has_bf16_eup():
    try:
        kind = jax.devices()[0].device_kind.lower()
        return ("v6" in kind) or ("v7" in kind)
    except Exception:
        return False


def _seg_ce_kernel(seg_ref, tgt_ref, acc_ref, *,
                   hw, tile_rows, acc_rows, tiles_per_chunk,
                   mask_start_tile, exp_in_bf16):
    cb = pl.program_id(1)
    t = pl.program_id(2)

    @pl.when(t == 0)
    def _init():
        acc_ref[...] = jnp.zeros_like(acc_ref)

    x = seg_ref[0].astype(jnp.float32)   # (C, R, 128): rows on sublanes, lanes dense
    tgt = tgt_ref[0, 0]                  # (R, 128) int32

    # Class reduction over the leading (major) axis: pure elementwise work on fully
    # occupied (R, 128) planes -- no sublane-sparse (C, T) / (1, T) vregs.
    m = jnp.max(x, axis=0)                                            # (R, 128)
    z = x - m[None, :, :]
    if exp_in_bf16:
        e = jnp.exp(z.astype(jnp.bfloat16)).astype(jnp.float32)       # bf16 EUP path
    else:
        e = jnp.exp(z)
    lse = jnp.log(jnp.sum(e, axis=0)) + m                             # (R, 128)
    cls = jax.lax.broadcasted_iota(jnp.int32, x.shape, 0)             # (C, R, 128)
    picked = jnp.sum(jnp.where(cls == tgt[None, :, :], x, 0.0), axis=0)
    contrib = lse - picked                                            # (R, 128)

    def _accumulate(vals):
        # Fold rows into a lane-dense (ACC_ROWS, 128) running sum: full-vreg VALU
        # adds and an unmasked 128-lane store.  Scalar collapse happens in the
        # wrapper, once.
        if tile_rows > acc_rows:
            vals = vals.reshape(tile_rows // acc_rows, acc_rows, 128).sum(axis=0)
        acc_ref[0, 0] += vals

    if mask_start_tile is None:
        _accumulate(contrib)              # no tile of this launch can be ragged
    else:
        g = cb * tiles_per_chunk + t      # global spatial-tile index

        @pl.when(g < mask_start_tile)
        def _interior():
            _accumulate(contrib)

        @pl.when(g >= mask_start_tile)
        def _ragged_tail():
            row = jax.lax.broadcasted_iota(jnp.int32, (tile_rows, 128), 0)
            lane = jax.lax.broadcasted_iota(jnp.int32, (tile_rows, 128), 1)
            flat = (g * tile_rows + row) * 128 + lane
            _accumulate(jnp.where(flat < hw, contrib, 0.0))


def _segmentation_ce_mean(seg_logits_nchw, seg_targets_nhw):
    n, c, h, w = seg_logits_nchw.shape
    hw = h * w
    rows_total = pl.cdiv(hw, 128)
    hw_pad = rows_total * 128

    logits = seg_logits_nchw.reshape(n, c, hw)                 # native dtype, no f32 copy
    targets = seg_targets_nhw.reshape(n, 1, hw).astype(jnp.int32)
    if hw_pad != hw:
        # TODO(synk): this pad is one extra HBM copy; only taken when H*W is not a
        # multiple of 128 (uncommon for segmentation shapes).
        logits = jnp.pad(logits, ((0, 0), (0, 0), (0, hw_pad - hw)))
        targets = jnp.pad(targets, ((0, 0), (0, 0), (0, hw_pad - hw)))
    logits = logits.reshape(n, c, rows_total, 128)             # row-major split
    targets = targets.reshape(n, 1, rows_total, 128)

    in_bytes = logits.dtype.itemsize
    vmem_cap = _tpu_vmem_capacity_bytes()

    # VMEM per 128-lane row of a tile: double-buffered logits + targets plus the f32
    # intermediates the kernel materializes (x, exp, m/lse/picked/contrib planes).
    per_row_bytes = 128 * (2 * in_bytes * c + 2 * 4 + 4 * (2 * c + 6))
    tile_budget = min(vmem_cap // 2, 40 * 1024 * 1024)
    rows_budget = max(8, tile_budget // per_row_bytes)
    rows_target = max(8, (3 * 1024 * 1024) // (in_bytes * c * 128))  # ~3 MB logits block

    if rows_total <= 8:
        tile_rows = rows_total                      # tiny spatial: full extent
    else:
        tile_rows = min(rows_budget, rows_target, rows_total)
        tile_rows = max(8, (tile_rows // 8) * 8)
    acc_rows = min(8, tile_rows)

    tiles_total = pl.cdiv(rows_total, tile_rows)
    # Spatial super-chunk axis keeps both v7x TensorCores busy when N is 1 / odd.
    n_chunks = 2 if (n % 2 == 1 and tiles_total >= 2) else 1
    tiles_per_chunk = pl.cdiv(tiles_total, n_chunks)

    tile_elems = tile_rows * 128
    mask_start = hw // tile_elems                   # first tile that can be ragged
    if mask_start >= n_chunks * tiles_per_chunk:
        mask_start = None                           # no tile is ever ragged
    last_tile = tiles_total - 1

    def _row_block(cb, t):
        # Chunk-overflow tiles clamp to the last real block; their contribution is
        # masked to zero inside the kernel.
        return jnp.minimum(cb * tiles_per_chunk + t, last_tile)

    kernel = functools.partial(
        _seg_ce_kernel,
        hw=hw, tile_rows=tile_rows, acc_rows=acc_rows,
        tiles_per_chunk=tiles_per_chunk, mask_start_tile=mask_start,
        exp_in_bf16=(logits.dtype == jnp.bfloat16 and _has_bf16_eup()),
    )

    vmem_limit = int(min(vmem_cap * 3 // 4,
                         max(32 * 1024 * 1024,
                             per_row_bytes * tile_rows + 8 * 1024 * 1024)))

    cost = pl.CostEstimate(
        flops=6 * n * c * hw_pad + 4 * n * hw_pad,
        transcendentals=n * c * hw_pad + n * hw_pad,
        bytes_accessed=in_bytes * n * c * hw_pad + 4 * n * hw_pad
        + 4 * n * n_chunks * acc_rows * 128,
    )

    partials = pl.pallas_call(
        kernel,
        out_shape=jax.ShapeDtypeStruct((n, n_chunks, acc_rows, 128), jnp.float32),
        grid=(n, n_chunks, tiles_per_chunk),
        in_specs=[
            pl.BlockSpec((1, c, tile_rows, 128),
                         lambda i, cb, t: (i, 0, _row_block(cb, t), 0)),
            pl.BlockSpec((1, 1, tile_rows, 128),
                         lambda i, cb, t: (i, 0, _row_block(cb, t), 0)),
        ],
        out_specs=pl.BlockSpec((1, 1, acc_rows, 128),
                               lambda i, cb, t: (i, cb, 0, 0)),
        compiler_params=pltpu.CompilerParams(
            dimension_semantics=("parallel", "parallel", "arbitrary"),
            vmem_limit_bytes=vmem_limit,
        ),
        cost_estimate=cost,
    )(logits, targets)

    return jnp.sum(partials) / jnp.float32(n * hw)


def _cross_entropy_jnp(logits2d, targets1d):
    lg = logits2d.astype(jnp.float32)
    m = jnp.max(lg, axis=1, keepdims=True)
    lse = (jnp.log(jnp.sum(jnp.exp(lg - m), axis=1, keepdims=True)) + m)[:, 0]
    picked = jnp.take_along_axis(
        lg, targets1d.reshape(-1, 1).astype(jnp.int32), axis=1)[:, 0]
    return jnp.mean(lse - picked)


def geometric_loss(input_labels, input_segmentations, input_bboxes,
                   target_labels, target_segmentations, target_bboxes,
                   flag_labels=True, flag_segmentations=True, flag_bboxes=True):
    """Forward pass matching PyTorch GeometricLoss (weights = [1, 1, 0.001])."""
    zero = jnp.zeros((), jnp.float32)

    # Tiny (B, L) / (B, 4) terms stay in plain jnp (per perf review).
    labels_loss = (_cross_entropy_jnp(input_labels, target_labels)
                   if flag_labels else zero)
    segmentations_loss = (_segmentation_ce_mean(input_segmentations,
                                                target_segmentations)
                          if flag_segmentations else zero)
    if flag_bboxes:
        d = input_bboxes.astype(jnp.float32) - target_bboxes.astype(jnp.float32)
        bboxes_loss = jnp.mean(d * d)
    else:
        bboxes_loss = zero

    w0, w1, w2 = 1.0, 1.0, 0.001
    multiplication = w0 * labels_loss * w1 * segmentations_loss * w2 * bboxes_loss
    # TODO(synk): d/dx x^(1/3) is infinite at 0 -- fine for the forward-only module.
    loss = jnp.power(multiplication, 1.0 / 3.0)
    return loss, labels_loss, segmentations_loss, bboxes_loss


if __name__ == "__main__":
    def _reference(inp_lab, inp_seg, inp_bb, tgt_lab, tgt_seg, tgt_bb):
        c = inp_seg.shape[1]
        seg2d = jnp.transpose(inp_seg.astype(jnp.float32), (0, 2, 3, 1)).reshape(-1, c)
        lab = _cross_entropy_jnp(inp_lab, tgt_lab)
        seg = _cross_entropy_jnp(seg2d, tgt_seg.reshape(-1))
        bb = jnp.mean((inp_bb.astype(jnp.float32) - tgt_bb.astype(jnp.float32)) ** 2)
        return (1.0 * lab * 1.0 * seg * 0.001 * bb) ** (1.0 / 3.0), lab, seg, bb

    def _run_case(seed, batch, n_lab_cls, n_seg_cls, h, w):
        key = jax.random.PRNGKey(seed)
        k1, k2, k3, k4, k5, k6 = jax.random.split(key, 6)
        inp_lab = jax.random.normal(k1, (batch, n_lab_cls), jnp.float32)
        tgt_lab = jax.random.randint(k2, (batch,), 0, n_lab_cls, jnp.int32)
        inp_seg = jax.random.normal(k3, (batch, n_seg_cls, h, w), jnp.float32)
        tgt_seg = jax.random.randint(k4, (batch, h, w), 0, n_seg_cls, jnp.int32)
        inp_bb = jax.random.normal(k5, (batch, 4), jnp.float32)
        tgt_bb = jax.random.normal(k6, (batch, 4), jnp.float32)

        got = jax.jit(geometric_loss)(inp_lab, inp_seg, inp_bb,
                                      tgt_lab, tgt_seg, tgt_bb)
        got = jax.block_until_ready(got)
        ref = _reference(inp_lab, inp_seg, inp_bb, tgt_lab, tgt_seg, tgt_bb)
        for g, r in zip(got, ref):
            err = abs(float(g) - float(r))
            assert err <= 1e-4 * max(1.0, abs(float(r))), (seed, float(g), float(r))

    # Primary small case (module-consistent shapes).
    _run_case(seed=0, batch=2, n_lab_cls=10, n_seg_cls=5, h=16, w=16)
    # H*W not a multiple of 128 (exercises the pad + ragged-tail lane mask).
    _run_case(seed=1, batch=3, n_lab_cls=7, n_seg_cls=6, h=20, w=20)
    # batch=1, multi-tile spatial (exercises the 2-chunk parallel split + ragged rows).
    _run_case(seed=2, batch=1, n_lab_cls=4, n_seg_cls=7, h=48, w=48)

    print("KERNEL_OK")
</pallas_src>

<mosaic_0001>
module attributes {stable_mosaic.version = 11 : i64} {
  func.func @_seg_ce_kernel(%arg0: i32, %arg1: i32, %arg2: i32, %arg3: memref<1x5x2x128xf32, #tpu.memory_space<vmem>>, %arg4: memref<1x1x2x128xi32, #tpu.memory_space<vmem>>, %arg5: memref<1x1x2x128xf32, #tpu.memory_space<vmem>>) attributes {dimension_semantics = [#tpu.dimension_semantics<parallel>, #tpu.dimension_semantics<parallel>, #tpu.dimension_semantics<arbitrary>], iteration_bounds = array<i64: 2, 1, 1>, scalar_prefetch = 0 : i64, scratch_operands = 0 : i64, tpu.core_type = #tpu.core_type<tc>, window_params = [{transform_indices = @transform_0, window_bounds = array<i64: 1, 5, 2, 128>}, {transform_indices = @transform_1, window_bounds = array<i64: 1, 1, 2, 128>}, {transform_indices = @transform_2, window_bounds = array<i64: 1, 1, 2, 128>}]} {
    %c0_i32 = arith.constant 0 : i32
    %0 = arith.cmpi eq, %arg2, %c0_i32 : i32
    %1 = arith.extui %0 : i1 to i32
    %c0_i32_0 = arith.constant 0 : i32
    %2 = arith.cmpi ne, %1, %c0_i32_0 : i32
    scf.if %2 {
      %cst_19 = arith.constant 0.000000e+00 : f32
      %29 = vector.broadcast %cst_19 : f32 to vector<1x1x2x128xf32>
      %c0_20 = arith.constant 0 : index
      %c0_21 = arith.constant 0 : index
      %c0_22 = arith.constant 0 : index
      %c0_23 = arith.constant 0 : index
      %30 = vector.load %arg5[%c0_20, %c0_21, %c0_22, %c0_23] : memref<1x1x2x128xf32, #tpu.memory_space<vmem>>, vector<1x1x2x128xf32>
      tpu.vector_store %arg5[%c0_20, %c0_21, %c0_22, %c0_23], %29 {strides = array<i32>} : memref<1x1x2x128xf32, #tpu.memory_space<vmem>>, vector<1x1x2x128xf32>,
    } else {
    }
    %c0 = arith.constant 0 : index
    %c0_1 = arith.constant 0 : index
    %c0_2 = arith.constant 0 : index
    %c0_3 = arith.constant 0 : index
    %3 = vector.load %arg3[%c0, %c0_1, %c0_2, %c0_3] : memref<1x5x2x128xf32, #tpu.memory_space<vmem>>, vector<1x5x2x128xf32>
    %4 = vector.shape_cast %3 : vector<1x5x2x128xf32> to vector<5x2x128xf32>
    %c0_4 = arith.constant 0 : index
    %c0_5 = arith.constant 0 : index
    %c0_6 = arith.constant 0 : index
    %c0_7 = arith.constant 0 : index
    %5 = vector.load %arg4[%c0_4, %c0_5, %c0_6, %c0_7] : memref<1x1x2x128xi32, #tpu.memory_space<vmem>>, vector<1x1x2x128xi32>
    %6 = vector.shape_cast %5 : vector<1x1x2x128xi32> to vector<2x128xi32>
    %cst = arith.constant dense<0xFF800000> : vector<2x128xf32>
    %7 = vector.multi_reduction <maximumf>, %4, %cst [0] : vector<5x2x128xf32> to vector<2x128xf32>
    %8 = vector.shape_cast %7 : vector<2x128xf32> to vector<1x2x128xf32>
    %9 = vector.broadcast %8 : vector<1x2x128xf32> to vector<5x2x128xf32>
    %10 = arith.subf %4, %9 : vector<5x2x128xf32>
    %11 = math.exp %10 : vector<5x2x128xf32>
    %cst_8 = arith.constant dense<0.000000e+00> : vector<2x128xf32>
    %12 = vector.multi_reduction <add>, %11, %cst_8 [0] : vector<5x2x128xf32> to vector<2x128xf32>
    %13 = math.log %12 : vector<2x128xf32>
    %14 = arith.addf %13, %7 : vector<2x128xf32>
    %15 = tpu.iota {dimensions = array<i32: 0>} : vector<5x2x128xi32>
    %16 = vector.shape_cast %6 : vector<2x128xi32> to vector<1x2x128xi32>
    %17 = vector.broadcast %16 : vector<1x2x128xi32> to vector<5x2x128xi32>
    %18 = arith.cmpi eq, %15, %17 : vector<5x2x128xi32>
    %cst_9 = arith.constant 0.000000e+00 : f32
    %19 = vector.broadcast %cst_9 : f32 to vector<5x2x128xf32>
    %20 = arith.select %18, %4, %19 : vector<5x2x128xi1>, vector<5x2x128xf32>
    %cst_10 = arith.constant dense<0.000000e+00> : vector<2x128xf32>
    %21 = vector.multi_reduction <add>, %20, %cst_10 [0] : vector<5x2x128xf32> to vector<2x128xf32>
    %22 = arith.subf %14, %21 : vector<2x128xf32>
    %c0_11 = arith.constant 0 : index
    %c0_12 = arith.constant 0 : index
    %c0_13 = arith.constant 0 : index
    %c0_14 = arith.constant 0 : index
    %23 = vector.load %arg5[%c0_11, %c0_12, %c0_13, %c0_14] : memref<1x1x2x128xf32, #tpu.memory_space<vmem>>, vector<1x1x2x128xf32>
    %24 = vector.shape_cast %23 : vector<1x1x2x128xf32> to vector<2x128xf32>
    %25 = arith.addf %24, %22 : vector<2x128xf32>
    %c0_15 = arith.constant 0 : index
    %c0_16 = arith.constant 0 : index
    %c0_17 = arith.constant 0 : index
    %c0_18 = arith.constant 0 : index
    %26 = vector.load %arg5[%c0_15, %c0_16, %c0_17, %c0_18] : memref<1x1x2x128xf32, #tpu.memory_space<vmem>>, vector<1x1x2x128xf32>
    %27 = vector.shape_cast %26 : vector<1x1x2x128xf32> to vector<2x128xf32>
    %28 = vector.shape_cast %25 : vector<2x128xf32> to vector<1x1x2x128xf32>
    tpu.vector_store %arg5[%c0_15, %c0_16, %c0_17, %c0_18], %28 {strides = array<i32>} : memref<1x1x2x128xf32, #tpu.memory_space<vmem>>, vector<1x1x2x128xf32>,
    return
  }
  func.func @transform_0(%arg0: i32, %arg1: i32, %arg2: i32) -> (i32, i32, i32, i32) {
    %c1_i32 = arith.constant 1 : i32
    %0 = arith.muli %arg1, %c1_i32 : i32
    %1 = arith.addi %0, %arg2 : i32
    %c0_i32 = arith.constant 0 : i32
    %2 = arith.minsi %1, %c0_i32 : i32
    %c0_i32_0 = arith.constant 0 : i32
    %c0_i32_1 = arith.constant 0 : i32
    %c0_i32_2 = arith.constant 0 : i32
    return %arg0, %c0_i32_0, %2, %c0_i32_1 : i32, i32, i32, i32
  }
  func.func @transform_1(%arg0: i32, %arg1: i32, %arg2: i32) -> (i32, i32, i32, i32) {
    %c1_i32 = arith.constant 1 : i32
    %0 = arith.muli %arg1, %c1_i32 : i32
    %1 = arith.addi %0, %arg2 : i32
    %c0_i32 = arith.constant 0 : i32
    %2 = arith.minsi %1, %c0_i32 : i32
    %c0_i32_0 = arith.constant 0 : i32
    %c0_i32_1 = arith.constant 0 : i32
    %c0_i32_2 = arith.constant 0 : i32
    return %arg0, %c0_i32_0, %2, %c0_i32_1 : i32, i32, i32, i32
  }
  func.func @transform_2(%arg0: i32, %arg1: i32, %arg2: i32) -> (i32, i32, i32, i32) {
    %c0_i32 = arith.constant 0 : i32
    %c0_i32_0 = arith.constant 0 : i32
    %c0_i32_1 = arith.constant 0 : i32
    return %arg0, %arg1, %c0_i32, %c0_i32_0 : i32, i32, i32, i32
  }
}

</mosaic_0001>

<bundles_post_ra>
// kernel: geometric_loss.1
= control target key start
LH: loop header
LB: loop body
LE: loop exit
PB: predicated region body
PF: predicated region fallthrough
CT: control target
= control target key end

     0   :  { %s504_s9 = smov 0   ;;  %s506_s10 = smov 0   ;;  %s568_s0 = inlined_call_operand.vmem [shape: f32[2,5,2,128], index: 0, kind: input, shape index: {}]   ;;  %s569_s1 = inlined_call_operand.vmem [shape: s32[2,1,2,128], index: 1, kind: input, shape index: {}]   ;;  %s570_s2 = inlined_call_operand.vmem [shape: f32[2,1,2,128], index: 2, kind: output, shape index: {}]  }
   0x1   :  { %s508_s11 = smov 0  }
   0x2 LB: > { %s31_s12 = sadd.s32 1, %s482_s10  ;;  %p420_p0 = scmp.ge.s32.totalorder %s486_s11, 1  ;;  %s486_s11 = sphi %s508_s11, %s12_s11   ;;  %s482_s10 = sphi %s506_s10, %s572_s10   ;;  %s478_s9 = sphi %s504_s9, %s571_s9  }
   0x3   : > { %p33_p1 = scmp.ge.s32.totalorder %s31_s12, 2  ;;  %p176_p2 = scmp.lt.s32.totalorder %s486_s11, 3 }
   0x5   : > { %s574_s12 = smov (%p33_p1, %s31_s12), 0  ;;  %p177_p3 = pnand %p420_p0, %p176_p2 }
   0x6   : > { %p219_p4 = scmp.lt.s32.totalorder (!%p177_p3), %s478_s9, 1  ;;  %v488_v0 = vmov (!%p177_p3), 0.0   ;;  %vm261_vm0 = vcmask (!%p177_p3), 1041408  }
   0x7   : > { %180 = sbr.rel (%p177_p3) target bundleno = 72 (0x48), region = 28 }
   0xe   : > { %s576_s9 = smov (!%p219_p4, %s478_s9), 1 }
   0xf   : > { %s426_s13 = smul.u32 10, %s576_s9  ;;  %s422_s14 = sshll.u32 %s576_s9, 1 }
  0x10   : > { %s531_s17 = scalar_lea.vmem %s570_s2, %s422_s14  ;;  %s239_s23 = scalar_lea.vmem %s569_s1, %s422_s14 }
  0x11   : > { %s226_s20 = scalar_lea.vmem %s568_s0, %s426_s13  ;;  %254 = vst [vmem:[%s531_s17] sm:$0x3] %v488_v0  ;;  %v260_v25 = vld [vmem:[%s239_s23] sm:$0x3] }
  0x12   : > { %v255_v1 = vld [vmem:[%s226_s20] sm:$0x3]  ;;  %v257_v2 = vld [vmem:[%s226_s20 + $0x4] sm:$0x3]  ;;  %v258_v3 = vld [vmem:[%s226_s20 + $0x6] sm:$0x3] }
  0x13   : > { %v256_v4 = vld [vmem:[%s226_s20 + $0x2] sm:$0x3]  ;;  %v259_v5 = vld [vmem:[%s226_s20 + $0x8] sm:$0x3]  ;;  %v262_v6 = vsel %vm261_vm0, %v255_v1, -inf  ;;  %v264_v7 = vsel %vm261_vm0, %v257_v2, -inf }
  0x14   : > { %v265_v8 = vsel %vm261_vm0, %v258_v3, -inf  ;;  %v263_v9 = vsel %vm261_vm0, %v256_v4, -inf  ;;  %v266_v10 = vsel %vm261_vm0, %v259_v5, -inf  ;;  %vm298_vm1 = vcmp.eq.s32.totalorder %v260_v25, 0 }
  0x15   : > { %v269_v11 = vmax.f32 %v264_v7, %v265_v8  ;;  %v267_v12 = vmax.f32 %v262_v6, %v266_v10  ;;  %vm299_vm2 = vcmp.eq.s32.totalorder %v260_v25, 1  ;;  %v303_v35 = vsel %vm298_vm1, %v255_v1, 0.0 }
  0x16   : > { %v304_v36 = vsel %vm299_vm2, %v256_v4, 0.0  ;;  %vm300_vm3 = vcmp.eq.s32.totalorder %v260_v25, 2  ;;  %v308_v40 = vsel %vm261_vm0, %v303_v35, 0.0  ;;  %vm301_vm4 = vcmp.eq.s32.totalorder %v260_v25, 3 }
  0x17   : > { %v268_v13 = vmax.f32 %v267_v12, %v263_v9  ;;  %v309_v41 = vsel %vm261_vm0, %v304_v36, 0.0  ;;  %v305_v43 = vsel %vm300_vm3, %v257_v2, 0.0  ;;  %v306_v47 = vsel %vm301_vm4, %v258_v3, 0.0 }
  0x18   : > { %v310_v45 = vadd.f32 %v309_v41, %v308_v40  ;;  %v311_v46 = vsel %vm261_vm0, %v305_v43, 0.0  ;;  %vm302_vm5 = vcmp.eq.s32.totalorder %v260_v25, 4  ;;  %v313_v49 = vsel %vm261_vm0, %v306_v47, 0.0  ;;  %v318_v57 = vld [vmem:[%s531_s17] sm:$0x3] }
  0x19   : > { %v270_v14 = vmax.f32 %v268_v13, %v269_v11  ;;  %v307_v50 = vsel %vm302_vm5, %v259_v5, 0.0 }
  0x1a   : > { %v312_v48 = vadd.f32 %v311_v46, %v310_v45  ;;  %v315_v52 = vsel %vm261_vm0, %v307_v50, 0.0 }
  0x1b   : > { %v271_v15 = vsub.f32 %v255_v1, %v270_v14  ;;  %v272_v16 = vsub.f32 %v256_v4, %v270_v14  ;;  %v273_v17 = vsub.f32 %v257_v2, %v270_v14  ;;  %v274_v18 = vsub.f32 %v258_v3, %v270_v14 }
  0x1c   : > { %v275_v19 = vsub.f32 %v259_v5, %v270_v14  ;;  %v314_v51 = vadd.f32 %v313_v49, %v312_v48 }
  0x1d   : > { %v276_v20 = vmul.f32 1.442695, %v271_v15  ;;  %v278_v21 = vmul.f32 1.442695, %v272_v16  ;;  %v280_v22 = vmul.f32 1.442695, %v273_v17 }
  0x1e   : > { %v282_v23 = vmul.f32 1.442695, %v274_v18  ;;  %v284_v24 = vmul.f32 1.442695, %v275_v19  ;;  %v316_v55 = vadd.f32 %v315_v52, %v314_v51 }
  0x1f   : > { %452 = vpow2.f32 %v276_v20 }
  0x20   : > { %454 = vpow2.f32 %v278_v21 }
  0x21   : > { %456 = vpow2.f32 %v280_v22 }
  0x22   : > { %458 = vpow2.f32 %v282_v23 }
  0x23   : > { %460 = vpow2.f32 %v284_v24 }
  0x29   : > { %v453_v26 = vpop.eup %452 }
  0x2a   : > { %v455_v27 = vpop.eup %454  ;;  %v286_v28 = vsel %vm261_vm0, %v453_v26, 0.0 }
  0x2b   : > { %v457_v29 = vpop.eup %456  ;;  %v287_v30 = vsel %vm261_vm0, %v455_v27, 0.0 }
  0x2c   : > { %v459_v31 = vpop.eup %458  ;;  %v288_v32 = vadd.f32 %v287_v30, %v286_v28  ;;  %v289_v33 = vsel %vm261_vm0, %v457_v29, 0.0 }
  0x2d   : > { %v461_v34 = vpop.eup %460  ;;  %v291_v37 = vsel %vm261_vm0, %v459_v31, 0.0 }
  0x2e   : > { %v290_v38 = vadd.f32 %v289_v33, %v288_v32  ;;  %v293_v39 = vsel %vm261_vm0, %v461_v34, 0.0 }
  0x30   : > { %v292_v42 = vadd.f32 %v291_v37, %v290_v38 }
  0x32   : > { %v294_v44 = vadd.f32 %v293_v39, %v292_v42 }
  0x34   : > { %462 = vlog2.f32 %v294_v44 }
  0x3e   : > { %v463_v53 = vpop.eup %462 }
  0x3f   : > { %v296_v54 = vmul.f32 0.6931472, %v463_v53 }
  0x41   : > { %v297_v56 = vadd.f32 %v296_v54, %v270_v14 }
  0x43   : > { %v317_v58 = vsub.f32 %v297_v56, %v316_v55 }
  0x45   : > { %v319_v59 = vadd.f32 %v318_v57, %v317_v58 }
  0x47   : > { %320 = vst [vmem:[%s531_s17] sm:$0x3] %v319_v59 }
  0x48 PF: > { %s12_s11 = sadd.s32 1, %s486_s11   ;;  %s571_s9 = smov %s482_s10 }
  0x49   : > { %p9_p5 = scmp.ge.s32.totalorder %s12_s11, 4   ;;  %s572_s10 = smov %s574_s12 }
  0x4b   :  { %11 = sbr.rel (!%p9_p5) target bundleno = 2 (0x2), region = 65 }

</bundles_post_ra>
